<compile_context>
chip_gen: v6e
topology: v6e:2x2x1
jax: 0.10.0
libtpu: 0.0.40
codegen_flags: <defaults>
</compile_context>

<pallas_src>
import functools

import jax
import jax.numpy as jnp
from jax.experimental import pallas as pl
from jax.experimental.pallas import tpu as pltpu

HIDDEN_W = 20
ENV_SIZE = 9
INPUT_W = ENV_SIZE + 1          # 10 policy logits
OUT_W = INPUT_W + 1             # 11 fc2 outputs (10 logits + 1 value)
DEFAULT_BLOCK_ROWS = 1024       # batch rows per grid step (large tiles amortize step overhead)


def _round_up(x, m):
    return ((x + m - 1) // m) * m


def _prediction_kernel(x_ref, w1_ref, b1_ref, w2_ref, b2_ref, p_ref, v_ref):
    # fc1 + ReLU
    h = jnp.dot(x_ref[...], w1_ref[...], preferred_element_type=jnp.float32) + b1_ref[...]
    h = jnp.maximum(h, 0.0)
    # fc2: columns 0..9 are policy logits, column 10 is the value head
    y = jnp.dot(h, w2_ref[...], preferred_element_type=jnp.float32) + b2_ref[...]   # (tb, 11)

    logits = y[:, :INPUT_W]                                    # (tb, 10)
    m = jnp.max(logits, axis=-1, keepdims=True)
    e = jnp.exp(logits - m)
    denom = jnp.sum(e, axis=-1, keepdims=True)
    p_ref[...] = e / denom                                     # exact: probs sum to 1 in f32
    v_ref[...] = y[:, INPUT_W:OUT_W]                           # (tb, 1) raw value output


def prepare_params(w1, b1, w2, b2):
    """One-time weight prep (transpose to right-multiply layout), hoisted out of the hot path.

    w1: (20, 20), b1: (20,), w2: (11, 20), b2: (11,)  -- PyTorch Linear layouts.
    """
    w1t = jnp.asarray(w1, jnp.float32).T           # (20, 20)
    b1r = jnp.asarray(b1, jnp.float32)[None, :]    # (1, 20)
    w2t = jnp.asarray(w2, jnp.float32).T           # (20, 11)
    b2r = jnp.asarray(b2, jnp.float32)[None, :]    # (1, 11)
    return w1t, b1r, w2t, b2r


@functools.partial(jax.jit, static_argnames=("block_rows",))
def prediction_net_batched(xs, w1t, b1r, w2t, b2r, *, block_rows=DEFAULT_BLOCK_ROWS):
    """Per-row PredictionNet forward. xs: (B, 20) f32. Returns (p: (B, 10), v: (B,))."""
    B = xs.shape[0]
    b8 = _round_up(B, 8)
    if b8 >= 16:
        # Keep the grid at >= 2 steps so v7x can shard the batch across its 2 TensorCores,
        # while never exceeding block_rows rows per step.
        tb = min(block_rows, _round_up(-(-b8 // 2), 8))
    else:
        tb = b8
    tb = max(tb, 8)
    b_pad = _round_up(b8, tb)
    if b_pad != B:
        # Ragged-tail pad only (usually just to a multiple of 8 / tile boundary).
        xs = jnp.pad(xs, ((0, b_pad - B), (0, 0)))

    probs, value = pl.pallas_call(
        _prediction_kernel,
        out_shape=(
            jax.ShapeDtypeStruct((b_pad, INPUT_W), jnp.float32),   # (B, 10) probs
            jax.ShapeDtypeStruct((b_pad, 1), jnp.float32),         # (B, 1)  value
        ),
        grid=(b_pad // tb,),
        in_specs=[
            pl.BlockSpec((tb, HIDDEN_W), lambda i: (i, 0)),          # batch tile of inputs
            pl.BlockSpec((HIDDEN_W, HIDDEN_W), lambda i: (0, 0)),    # weights stay VMEM-resident
            pl.BlockSpec((1, HIDDEN_W), lambda i: (0, 0)),
            pl.BlockSpec((HIDDEN_W, OUT_W), lambda i: (0, 0)),
            pl.BlockSpec((1, OUT_W), lambda i: (0, 0)),
        ],
        out_specs=(
            pl.BlockSpec((tb, INPUT_W), lambda i: (i, 0)),
            pl.BlockSpec((tb, 1), lambda i: (i, 0)),
        ),
        compiler_params=pltpu.CompilerParams(
            dimension_semantics=("parallel",)),                      # 2 TCs on v7x
    )(xs, w1t, b1r, w2t, b2r)

    return probs[:B], value[:B, 0]


def prediction_net(x, w1t, b1r, w2t, b2r):
    """Original module semantics: x: (20,) f32 -> (p: (10,), v: scalar)."""
    p, v = prediction_net_batched(x[None, :], w1t, b1r, w2t, b2r, block_rows=8)
    return p[0], v[0]


def prediction_net_ref(x, w1, b1, w2, b2):
    """Pure-JAX reference mirroring the PyTorch forward (high-precision matmuls)."""
    h = jax.nn.relu(jnp.dot(x, w1.T, precision=jax.lax.Precision.HIGHEST) + b1)
    y = jnp.dot(h, w2.T, precision=jax.lax.Precision.HIGHEST) + b2
    return jax.nn.softmax(y[:-1]), y[-1]


if __name__ == "__main__":
    key = jax.random.PRNGKey(0)
    k_x, k_xb, k_w1, k_b1, k_w2, k_b2 = jax.random.split(key, 6)

    # Deterministic synthetic parameters (PyTorch-style uniform(-1/sqrt(fan_in), 1/sqrt(fan_in)))
    bound1 = 1.0 / (HIDDEN_W ** 0.5)
    w1 = jax.random.uniform(k_w1, (HIDDEN_W, HIDDEN_W), jnp.float32, -bound1, bound1)
    b1 = jax.random.uniform(k_b1, (HIDDEN_W,), jnp.float32, -bound1, bound1)
    w2 = jax.random.uniform(k_w2, (OUT_W, HIDDEN_W), jnp.float32, -bound1, bound1)
    b2 = jax.random.uniform(k_b2, (OUT_W,), jnp.float32, -bound1, bound1)

    params = prepare_params(w1, b1, w2, b2)   # done once, outside the hot path

    # --- single-vector forward: exact PyTorch semantics ---
    x = jax.random.normal(k_x, (HIDDEN_W,), jnp.float32)
    p, v = prediction_net(x, *params)
    p = jax.block_until_ready(p)
    v = jax.block_until_ready(v)
    p_ref, v_ref = prediction_net_ref(x, w1, b1, w2, b2)
    assert p.shape == (INPUT_W,)
    assert v.shape == ()
    assert jnp.allclose(p, p_ref, atol=2e-3, rtol=2e-3)
    assert jnp.allclose(v, v_ref, atol=2e-3, rtol=2e-3)
    # exact division -> normalized probabilities at f32 precision
    assert jnp.allclose(jnp.sum(p), 1.0, atol=1e-5)

    # --- batched forward: amortizes launch/DMA overhead across the batch ---
    B = 256
    xb = jax.random.normal(k_xb, (B, HIDDEN_W), jnp.float32)
    pb, vb = prediction_net_batched(xb, *params)
    pb = jax.block_until_ready(pb)
    vb = jax.block_until_ready(vb)
    pb_ref, vb_ref = jax.vmap(lambda xi: prediction_net_ref(xi, w1, b1, w2, b2))(xb)
    assert pb.shape == (B, INPUT_W)
    assert vb.shape == (B,)
    assert jnp.allclose(pb, pb_ref, atol=2e-3, rtol=2e-3)
    assert jnp.allclose(vb, vb_ref, atol=2e-3, rtol=2e-3)
    assert jnp.allclose(jnp.sum(pb, axis=-1), 1.0, atol=1e-5)

    print("KERNEL_OK")
</pallas_src>

<mosaic_0001>
module attributes {stable_mosaic.version = 11 : i64} {
  func.func @_prediction_kernel(%arg0: i32, %arg1: memref<8x20xf32, #tpu.memory_space<vmem>>, %arg2: memref<20x20xf32, #tpu.memory_space<vmem>>, %arg3: memref<1x20xf32, #tpu.memory_space<vmem>>, %arg4: memref<20x11xf32, #tpu.memory_space<vmem>>, %arg5: memref<1x11xf32, #tpu.memory_space<vmem>>, %arg6: memref<8x10xf32, #tpu.memory_space<vmem>>, %arg7: memref<8x1xf32, #tpu.memory_space<vmem>>) attributes {dimension_semantics = [#tpu.dimension_semantics<parallel>], iteration_bounds = array<i64: 1>, scalar_prefetch = 0 : i64, scratch_operands = 0 : i64, tpu.core_type = #tpu.core_type<tc>, window_params = [{transform_indices = @transform_0, window_bounds = array<i64: 8, 20>}, {pipeline_mode = #tpu.pipeline_mode<synchronous>, transform_indices = @transform_1, window_bounds = array<i64: 20, 20>}, {pipeline_mode = #tpu.pipeline_mode<synchronous>, transform_indices = @transform_2, window_bounds = array<i64: 1, 20>}, {pipeline_mode = #tpu.pipeline_mode<synchronous>, transform_indices = @transform_3, window_bounds = array<i64: 20, 11>}, {pipeline_mode = #tpu.pipeline_mode<synchronous>, transform_indices = @transform_4, window_bounds = array<i64: 1, 11>}, {transform_indices = @transform_5, window_bounds = array<i64: 8, 10>}, {transform_indices = @transform_6, window_bounds = array<i64: 8, 1>}]} {
    %c0 = arith.constant 0 : index
    %c0_0 = arith.constant 0 : index
    %0 = vector.load %arg1[%c0, %c0_0] : memref<8x20xf32, #tpu.memory_space<vmem>>, vector<8x20xf32>
    %c0_1 = arith.constant 0 : index
    %c0_2 = arith.constant 0 : index
    %1 = vector.load %arg2[%c0_1, %c0_2] : memref<20x20xf32, #tpu.memory_space<vmem>>, vector<20x20xf32>
    %cst = arith.constant dense<0.000000e+00> : vector<8x20xf32>
    %2 = tpu.matmul %0, %1, %cst {dimension_numbers = #tpu.dot_dimension_numbers<[1], [0], [0], [1], [0, 0, 1, 1], [], []>} : vector<8x20xf32>, vector<20x20xf32>, vector<8x20xf32> -> vector<8x20xf32>
    %c0_3 = arith.constant 0 : index
    %c0_4 = arith.constant 0 : index
    %3 = vector.load %arg3[%c0_3, %c0_4] : memref<1x20xf32, #tpu.memory_space<vmem>>, vector<1x20xf32>
    %4 = vector.broadcast %3 : vector<1x20xf32> to vector<8x20xf32>
    %5 = arith.addf %2, %4 : vector<8x20xf32>
    %cst_5 = arith.constant 0.000000e+00 : f32
    %6 = vector.broadcast %cst_5 : f32 to vector<8x20xf32>
    %7 = arith.maximumf %5, %6 : vector<8x20xf32>
    %c0_6 = arith.constant 0 : index
    %c0_7 = arith.constant 0 : index
    %8 = vector.load %arg4[%c0_6, %c0_7] : memref<20x11xf32, #tpu.memory_space<vmem>>, vector<20x11xf32>
    %cst_8 = arith.constant dense<0.000000e+00> : vector<8x11xf32>
    %9 = tpu.matmul %7, %8, %cst_8 {dimension_numbers = #tpu.dot_dimension_numbers<[1], [0], [0], [1], [0, 0, 1, 1], [], []>} : vector<8x20xf32>, vector<20x11xf32>, vector<8x11xf32> -> vector<8x11xf32>
    %c0_9 = arith.constant 0 : index
    %c0_10 = arith.constant 0 : index
    %10 = vector.load %arg5[%c0_9, %c0_10] : memref<1x11xf32, #tpu.memory_space<vmem>>, vector<1x11xf32>
    %11 = vector.broadcast %10 : vector<1x11xf32> to vector<8x11xf32>
    %12 = arith.addf %9, %11 : vector<8x11xf32>
    %13 = vector.extract_strided_slice %12 {offsets = [0, 0], sizes = [8, 10], strides = [1, 1]} : vector<8x11xf32> to vector<8x10xf32>
    %cst_11 = arith.constant dense<0xFF800000> : vector<8xf32>
    %14 = vector.multi_reduction <maximumf>, %13, %cst_11 [1] : vector<8x10xf32> to vector<8xf32>
    %15 = vector.shape_cast %14 : vector<8xf32> to vector<8x1xf32>
    %16 = vector.broadcast %15 : vector<8x1xf32> to vector<8x10xf32>
    %17 = arith.subf %13, %16 : vector<8x10xf32>
    %18 = math.exp %17 : vector<8x10xf32>
    %cst_12 = arith.constant dense<0.000000e+00> : vector<8xf32>
    %19 = vector.multi_reduction <add>, %18, %cst_12 [1] : vector<8x10xf32> to vector<8xf32>
    %20 = vector.shape_cast %19 : vector<8xf32> to vector<8x1xf32>
    %21 = vector.broadcast %20 : vector<8x1xf32> to vector<8x10xf32>
    %22 = arith.divf %18, %21 : vector<8x10xf32>
    %c0_13 = arith.constant 0 : index
    %c0_14 = arith.constant 0 : index
    %23 = vector.load %arg6[%c0_13, %c0_14] : memref<8x10xf32, #tpu.memory_space<vmem>>, vector<8x10xf32>
    tpu.vector_store %arg6[%c0_13, %c0_14], %22 {strides = array<i32>} : memref<8x10xf32, #tpu.memory_space<vmem>>, vector<8x10xf32>,
    %24 = vector.extract_strided_slice %12 {offsets = [0, 10], sizes = [8, 1], strides = [1, 1]} : vector<8x11xf32> to vector<8x1xf32>
    %c0_15 = arith.constant 0 : index
    %c0_16 = arith.constant 0 : index
    %25 = vector.load %arg7[%c0_15, %c0_16] : memref<8x1xf32, #tpu.memory_space<vmem>>, vector<8x1xf32>
    tpu.vector_store %arg7[%c0_15, %c0_16], %24 {strides = array<i32>} : memref<8x1xf32, #tpu.memory_space<vmem>>, vector<8x1xf32>,
    return
  }
  func.func @transform_0(%arg0: i32) -> (i32, i32) {
    %c0_i32 = arith.constant 0 : i32
    %c0_i32_0 = arith.constant 0 : i32
    return %arg0, %c0_i32 : i32, i32
  }
  func.func @transform_1(%arg0: i32) -> (i32, i32) {
    %c0_i32 = arith.constant 0 : i32
    %c0_i32_0 = arith.constant 0 : i32
    %c0_i32_1 = arith.constant 0 : i32
    return %c0_i32, %c0_i32_0 : i32, i32
  }
  func.func @transform_2(%arg0: i32) -> (i32, i32) {
    %c0_i32 = arith.constant 0 : i32
    %c0_i32_0 = arith.constant 0 : i32
    %c0_i32_1 = arith.constant 0 : i32
    return %c0_i32, %c0_i32_0 : i32, i32
  }
  func.func @transform_3(%arg0: i32) -> (i32, i32) {
    %c0_i32 = arith.constant 0 : i32
    %c0_i32_0 = arith.constant 0 : i32
    %c0_i32_1 = arith.constant 0 : i32
    return %c0_i32, %c0_i32_0 : i32, i32
  }
  func.func @transform_4(%arg0: i32) -> (i32, i32) {
    %c0_i32 = arith.constant 0 : i32
    %c0_i32_0 = arith.constant 0 : i32
    %c0_i32_1 = arith.constant 0 : i32
    return %c0_i32, %c0_i32_0 : i32, i32
  }
  func.func @transform_5(%arg0: i32) -> (i32, i32) {
    %c0_i32 = arith.constant 0 : i32
    %c0_i32_0 = arith.constant 0 : i32
    return %arg0, %c0_i32 : i32, i32
  }
  func.func @transform_6(%arg0: i32) -> (i32, i32) {
    %c0_i32 = arith.constant 0 : i32
    %c0_i32_0 = arith.constant 0 : i32
    return %arg0, %c0_i32 : i32, i32
  }
}

</mosaic_0001>

<bundles_post_ra>
// kernel: prediction_net_batched.1
= control target key start
LH: loop header
LB: loop body
LE: loop exit
PB: predicated region body
PF: predicated region fallthrough
CT: control target
= control target key end

     0   :  { %vm37_vm0 = vcmask 1043456   ;;  %v264_v0 = vmov 0.0   ;;  %vm265_vm1 = vmmov 0   ;;  %vm33_vm2 = vcmask 162816   ;;  %s342_s1 = inlined_call_operand.vmem [shape: f32[20,20], index: 1, kind: input, shape index: {}]   ;;  %s343_s0 = inlined_call_operand.vmem [shape: f32[8,20], index: 0, kind: input, shape index: {}]   ;;  %s344_s3 = inlined_call_operand.vmem [shape: f32[20,11], index: 3, kind: input, shape index: {}]   ;;  %s345_s2 = inlined_call_operand.vmem [shape: f32[1,20], index: 2, kind: input, shape index: {}]   ;;  %s346_s4 = inlined_call_operand.vmem [shape: f32[1,11], index: 4, kind: input, shape index: {}]   ;;  %s347_s6 = inlined_call_operand.vmem [shape: f32[8,1], index: 6, kind: output, shape index: {1}]   ;;  %s348_s5 = inlined_call_operand.vmem [shape: f32[8,10], index: 5, kind: output, shape index: {0}]  }
   0x1   :  { %239 = vmatprep.subr.mxu0 %v264_v0  ;;  %v25_v1 = vld [vmem:[%s342_s1 + $0x10] sm:$0xf]  ;;  %v24_v2 = vld [vmem:[%s342_s1 + $0x8] sm:$0xff]  ;;  %245 = vmatprep.mubr.msk.f32.mxu0 %vm265_vm1, %v264_v0  ;;  %v23_v3 = vld [vmem:[%s342_s1] sm:$0xff]  ;;  %vm198_vm3 = vcmask 80896   ;;  %vm215_vm4 = vcmask 7168  }
   0x2   :  { %240 = vmatpush3.msk.msra.mxu0 %vm37_vm0, %v25_v1  ;;  %248 = vmatprep.subr.mxu1 %v264_v0  ;;  %v22_v4 = vld [vmem:[%s343_s0] sm:$0xff]  ;;  %v114_v5 = vld [vmem:[%s344_s3 + $0x10] sm:$0xf]  ;;  %v113_v6 = vld [vmem:[%s344_s3 + $0x8] sm:$0xff] }
   0x3   :  { %241 = vmatprep.subr.mxu0 %v264_v0  ;;  %254 = vmatprep.mubr.msk.f32.mxu1 %vm265_vm1, %v264_v0  ;;  %v112_v7 = vld [vmem:[%s344_s3] sm:$0xff]  ;;  %s266_s3 = smov 118  }
   0x4   :  { %242 = vmatpush3.msra.mxu0 %v24_v2  ;;  %249 = vmatpush3.msk.msra.mxu1 %vm37_vm0, %v114_v5  ;;  %v225_v8 = vld [vmem:[%s345_s2] ss:$0 sm:$0xff] }
   0x5   :  { %243 = vmatprep.subr.mxu0 %v264_v0  ;;  %250 = vmatprep.subr.mxu1 %v264_v0  ;;  %v228_v13 = vld [vmem:[%s346_s4] ss:$0 sm:$0xff] }
   0x6   :  { %244 = vmatpush3.msra.mxu0 %v23_v3  ;;  %251 = vmatpush3.msra.mxu1 %v113_v6 }
   0x7   :  { %246 = vmatmul.mubr.msk.f32.vlgmr.msra.gmra.mxu0 %vm33_vm2, %v22_v4  ;;  %252 = vmatprep.subr.mxu1 %v264_v0 }
   0x8   :  { %253 = vmatpush3.msra.mxu1 %v112_v7 }
  0xc7   :  { %v107_v9 = vpop.f32.mrf.mxu0 }
  0xc8   :  { %v108_v10 = vadd.f32 %v225_v8, %v107_v9 }
  0xc9   :  { %v247_v11 = vpop.f32.mrf.mxu0 }
  0xca   :  { %v111_v12 = vmax.f32 %v108_v10, 0.0 }
  0xcc   :  { %255 = vmatmul.mubr.msk.f32.vlgmr.msra.gmra.mxu1 %vm33_vm2, %v111_v12 }
 0x18c   :  { %v194_v14 = vpop.f32.mrf.mxu1 }
 0x18d   :  { %v195_v15 = vadd.f32 %v228_v13, %v194_v14 }
 0x18e   :  { %v256_v16 = vpop.f32.mrf.mxu1 }
 0x18f   :  { %212 = vrot.lane.b32.xlu1 %v195_v15, %s266_s3  ;;  %v199_v17 = vsel %vm198_vm3, %v195_v15, -inf }
 0x190   :  { %200 = vmax.xlane.f32.xlu0 %v199_v17 }
 0x201   :  { %v213_v18 = vpop.permute.xlu1 %212 }
 0x202   :  { %216 = vst.msk [vmem:[%s347_s6] sm:$0xff] %vm215_vm4, %v213_v18 }
 0x219   :  { %v201_v19 = vpop.xlane.xlu0 %200 }
 0x21a   :  { %v202_v20 = vsub.f32 %v195_v15, %v201_v19 }
 0x21c   :  { %v203_v21 = vmul.f32 1.442695, %v202_v20 }
 0x21e   :  { %260 = vpow2.f32 %v203_v21 }
 0x22b   :  { %v261_v22 = vpop.eup %260 }
 0x22c   :  { %v205_v23 = vsel %vm198_vm3, %v261_v22, 0.0 }
 0x22d   :  { %206 = vadd.xlane.f32.xlu0 %v205_v23 }
 0x2b6   :  { %v207_v24 = vpop.xlane.xlu0 %206 }
 0x2b7   :  { %262 = vrcp.f32 %v207_v24 }
 0x2c4   :  { %v263_v25 = vpop.eup %262 }
 0x2c5   :  { %v209_v26 = vmul.f32 %v263_v25, %v261_v22 }
 0x2c7   :  { %210 = vst.msk [vmem:[%s348_s5] sm:$0xff] %vm198_vm3, %v209_v26 }

</bundles_post_ra>
